<compile_context>
chip_gen: v5e
topology: v5e:2x2
jax: 0.10.0
libtpu: 0.0.40
codegen_flags: <defaults>
</compile_context>

<pallas_src>
import jax
import jax.numpy as jnp
from jax.experimental import pallas as pl
from jax.experimental.pallas import tpu as pltpu

_LANE = 128
_TARGET_BLOCK_BYTES = 4 << 20   # ~4 MiB per block
_MIN_GRID_STEPS = 4             # keep >=4 steps so v7x dual-TC + pipelining engage
_VMEM_LIMIT_BYTES = 32 << 20    # 2 bufs x (in+out) x 4 MiB = 16 MiB; give headroom


def _align_up(x, m):
    return ((x + m - 1) // m) * m


def _is_pre_v6_tpu():
    """True for TPU generations without bf16 VPU/EUP (v5e and older)."""
    try:
        kind = jax.devices()[0].device_kind.lower()
    except Exception:
        return False
    return any(tag in kind for tag in ("v2", "v3", "v4", "v5"))


def _compute_dtype(io_dtype):
    # bf16-native math keeps 2x elements per vreg on v6e/v7x (bf16 VPU + EUP),
    # halving VALU/EUP pressure; v5e and earlier must upcast to f32.
    if io_dtype == jnp.bfloat16 and not _is_pre_v6_tpu():
        return jnp.bfloat16
    return jnp.float32


def _make_aptx_kernel(alpha, beta, gamma, compute_dtype):
    """APTx(x) = (alpha + tanh(beta*x)) * gamma * x, constants baked in."""
    alpha = float(alpha)
    beta = float(beta)
    gamma = float(gamma)

    def kernel(x_ref, o_ref):
        x = x_ref[...].astype(compute_dtype)
        y = (alpha + jnp.tanh(beta * x)) * (gamma * x)
        o_ref[...] = y.astype(o_ref.dtype)

    return kernel


def _choose_row_tile(rows, itemsize):
    """Dtype-aware row tile: ~4 MiB blocks, multiple of the sublane pack,
    and split into >= _MIN_GRID_STEPS blocks whenever the array is not tiny."""
    pack = max(8, 32 // itemsize)                      # 8 f32, 16 bf16, 32 int8/fp8
    budget_rows = _TARGET_BLOCK_BYTES // (_LANE * itemsize)
    budget_rows = max(pack, (budget_rows // pack) * pack)
    if rows <= pack * _MIN_GRID_STEPS:
        # Too small to split usefully: one full-array block (divisibility rule
        # is lifted when the block equals the array dims).
        return rows
    # Block shape stays a multiple of the pack; last partial block is masked.
    return min(budget_rows, _align_up(pl.cdiv(rows, _MIN_GRID_STEPS), pack))


def _aptx_2d(x2d, alpha, beta, gamma):
    rows, _ = x2d.shape
    itemsize = jnp.dtype(x2d.dtype).itemsize
    row_tile = _choose_row_tile(rows, itemsize)
    grid = (pl.cdiv(rows, row_tile),)
    n = rows * _LANE

    return pl.pallas_call(
        _make_aptx_kernel(alpha, beta, gamma, _compute_dtype(x2d.dtype)),
        out_shape=jax.ShapeDtypeStruct((rows, _LANE), x2d.dtype),
        grid=grid,
        in_specs=[pl.BlockSpec((row_tile, _LANE), lambda i: (i, 0))],
        out_specs=pl.BlockSpec((row_tile, _LANE), lambda i: (i, 0)),
        compiler_params=pltpu.CompilerParams(
            dimension_semantics=("parallel",),
            vmem_limit_bytes=_VMEM_LIMIT_BYTES,
        ),
        cost_estimate=pl.CostEstimate(
            flops=3 * n,
            transcendentals=n,
            bytes_accessed=2 * n * itemsize,
        ),
    )(x2d)


def _aptx_jax(x, alpha, beta, gamma):
    """Plain-JAX path for sub-128-element pieces (not worth a kernel launch)."""
    cdt = _compute_dtype(x.dtype)
    xf = x.astype(cdt)
    return ((alpha + jnp.tanh(beta * xf)) * (gamma * xf)).astype(x.dtype)


def aptx(x, alpha=1.0, beta=1.0, gamma=0.5):
    """Elementwise APTx activation, matching the PyTorch module's forward."""
    orig_shape = x.shape
    n = x.size
    if n == 0:
        return x

    flat = x.reshape(-1)
    n_main = (n // _LANE) * _LANE

    if n_main == 0:
        # Entire tensor is smaller than one lane row.
        return _aptx_jax(flat, alpha, beta, gamma).reshape(orig_shape)

    main2d = flat[:n_main].reshape(n_main // _LANE, _LANE)
    out_flat = _aptx_2d(main2d, alpha, beta, gamma).reshape(-1)

    if n_main != n:
        # <128-element tail: tiny plain-JAX expression + concat.  Avoids the
        # old full-tensor pad + slice round trip (2 extra HBM copies).
        tail = _aptx_jax(flat[n_main:], alpha, beta, gamma)
        out_flat = jnp.concatenate([out_flat, tail])

    return out_flat.reshape(orig_shape)


if __name__ == "__main__":
    key = jax.random.PRNGKey(0)
    # NCHW input, consistent with typical conv activations.
    x = jax.random.normal(key, (2, 4, 16, 16), dtype=jnp.float32)

    # Module defaults (non-trainable buffers).
    alpha, beta, gamma = 1.0, 1.0, 0.5

    out = jax.block_until_ready(aptx(x, alpha=alpha, beta=beta, gamma=gamma))

    # Reference check in plain JAX.
    ref = (alpha + jnp.tanh(beta * x)) * gamma * x
    assert out.shape == x.shape and out.dtype == x.dtype
    assert jnp.allclose(out, ref, atol=1e-5, rtol=1e-5)

    print("KERNEL_OK")
</pallas_src>

<mosaic_0001>
module attributes {stable_mosaic.version = 11 : i64} {
  func.func @kernel(%arg0: i32, %arg1: memref<16x128xf32, #tpu.memory_space<vmem>>, %arg2: memref<16x128xf32, #tpu.memory_space<vmem>>) attributes {dimension_semantics = [#tpu.dimension_semantics<parallel>], iteration_bounds = array<i64: 1>, scalar_prefetch = 0 : i64, scratch_operands = 0 : i64, tpu.core_type = #tpu.core_type<tc>, window_params = [{transform_indices = @transform_0, window_bounds = array<i64: 16, 128>}, {transform_indices = @transform_1, window_bounds = array<i64: 16, 128>}]} {
    %c0 = arith.constant 0 : index
    %c0_0 = arith.constant 0 : index
    %0 = vector.load %arg1[%c0, %c0_0] : memref<16x128xf32, #tpu.memory_space<vmem>>, vector<16x128xf32>
    %cst = arith.constant 1.000000e+00 : f32
    %1 = vector.broadcast %cst : f32 to vector<16x128xf32>
    %2 = arith.mulf %1, %0 : vector<16x128xf32>
    %3 = math.tanh %2 : vector<16x128xf32>
    %cst_1 = arith.constant 1.000000e+00 : f32
    %4 = vector.broadcast %cst_1 : f32 to vector<16x128xf32>
    %5 = arith.addf %4, %3 : vector<16x128xf32>
    %cst_2 = arith.constant 5.000000e-01 : f32
    %6 = vector.broadcast %cst_2 : f32 to vector<16x128xf32>
    %7 = arith.mulf %6, %0 : vector<16x128xf32>
    %8 = arith.mulf %5, %7 : vector<16x128xf32>
    %c0_3 = arith.constant 0 : index
    %c0_4 = arith.constant 0 : index
    %9 = vector.load %arg2[%c0_3, %c0_4] : memref<16x128xf32, #tpu.memory_space<vmem>>, vector<16x128xf32>
    tpu.vector_store %arg2[%c0_3, %c0_4], %8 {strides = array<i32>} : memref<16x128xf32, #tpu.memory_space<vmem>>, vector<16x128xf32>,
    return
  }
  func.func @transform_0(%arg0: i32) -> (i32, i32) {
    %c0_i32 = arith.constant 0 : i32
    %c0_i32_0 = arith.constant 0 : i32
    return %arg0, %c0_i32 : i32, i32
  }
  func.func @transform_1(%arg0: i32) -> (i32, i32) {
    %c0_i32 = arith.constant 0 : i32
    %c0_i32_0 = arith.constant 0 : i32
    return %arg0, %c0_i32 : i32, i32
  }
}

</mosaic_0001>

<bundles_post_ra>
// kernel: tpu_custom_call.1
= control target key start
LH: loop header
LB: loop body
LE: loop exit
PB: predicated region body
PF: predicated region fallthrough
CT: control target
= control target key end

     0   :  { %6 = vsyncpa [#allocation3], 0  ;;  %s136_s0 = inlined_call_operand.hbm [shape: f32[16,128], index: 0, kind: input, shape index: {}]   ;;  %s137_s1 = inlined_call_operand.hbm [shape: f32[16,128], index: 1, kind: output, shape index: {}]  }
   0x1   :  { %7 = vsyncpa [#allocation4], 0  ;;  %s12_s8 = sshll.u32 %s136_s0, 4  ;;  %s116_s9 = smov [#allocation2]   ;;  %s13_s8 = int_to_ptr.hbm [resolvable:$true] %s12_s8 }
   0x2   :  { %s14_s10 = sshll.u32 %s116_s9, 4  ;;  %s117_s11 = smov 128   ;;  %s15_s10 = int_to_ptr.vmem [resolvable:$true] %s14_s10 }
   0x3   :  { %s118_s12 = smov 8  }
   0x4   :  { %20 = dma.hbm_to_vmem [thread:$0]  %s13_s8, 256, %s15_s10, [#allocation3], %s117_s11, %s117_s11, %s118_s12  }
   0x5   :  { %112 = dma.done.wait [#allocation3], 256  }
   0x6   :  { %113 = vsyncadd [#allocation3], 4294967040  ;;  %v25_v0 = vld [vmem:[#allocation2] sm:$0xff]  ;;  %v26_v1 = vld [vmem:[#allocation2 + $0x8] sm:$0xff]  ;;  %s119_s13 = smov [#allocation5]   ;;  %s43_s16 = sshll.u32 %s137_s1, 4  ;;  %s44_s16 = int_to_ptr.hbm [resolvable:$true] %s43_s16 }
   0x7   :  { %60 = vtanh.f32 %v25_v0  ;;  %v31_v2 = vmul.f32 0.5, %v25_v0  ;;  %v32_v4 = vmul.f32 0.5, %v26_v1  ;;  %s41_s0 = sshll.u32 %s119_s13, 4  ;;  %s42_s0 = int_to_ptr.vmem [resolvable:$true] %s41_s0 }
   0x8   :  { %62 = vtanh.f32 %v26_v1 }
   0xd   :  { %v61_v3 = vpop.eup %60 }
   0xe   :  { %v63_v5 = vpop.eup %62  ;;  %v29_v6 = vadd.f32 1.0, %v61_v3 }
   0xf   :  { %v30_v7 = vadd.f32 1.0, %v63_v5 }
  0x10   :  { %v33_v8 = vmul.f32 %v31_v2, %v29_v6 }
  0x11   :  { %v34_v9 = vmul.f32 %v32_v4, %v30_v7 }
  0x12   :  { %35 = vst [vmem:[#allocation5] sm:$0xff] %v33_v8 }
  0x13   :  { %36 = vst [vmem:[#allocation5 + $0x8] sm:$0xff] %v34_v9 }
  0x14   :  { %49 = dma.vmem_to_hbm [thread:$0]  %s42_s0, 256, %s44_s16, [#allocation4], %s117_s11, %s117_s11, %s118_s12  }
  0x15   :  { %114 = dma.done.wait [#allocation4], 256  }
  0x16   :  { %115 = vsyncadd [#allocation4], 4294967040 }
  0x17   :  { %54 = vsyncpa [#allocation3], 1 }
  0x18   :  { %55 = vsyncpa [#allocation4], 1 }

</bundles_post_ra>
